<compile_context>
chip_gen: v7x
topology: tpu7x:2x2x1
jax: 0.10.0
libtpu: 0.0.40
codegen_flags: <defaults>
</compile_context>

<pallas_src>
import numpy as np
import jax
import jax.numpy as jnp
from jax.experimental import pallas as pl
from jax.experimental.pallas import tpu as pltpu

# ---------------- problem sizes (small, consistent with the module) ----------
N    = 2                  # batch
CIN  = 4                  # in_ch
K    = 3                  # krnl_size
C2   = CIN * 2
H = W = 16
PAD  = K - 1              # 2
HOUT = H - (K - 1)        # 14 (valid conv output)
WOUT = W - (K - 1)        # 14
NB   = 3                  # n_res_block (stacked ResBlocks fused into one kernel)

XL   = N * W * CIN        # 128 : x / out slab lanes (batch folded into lanes)
ZL   = N * WOUT * C2      # 224 : valid z lanes
ZLP  = 256                # z lanes zero-padded to a lane-tile multiple

# conv2's top/bottom zero padding is provided by zeroing slab rows h >= HOUT and
# letting the row roll wrap onto them; that trick requires PAD == H - HOUT.
assert PAD == H - HOUT, "row-wrap padding scheme assumes PAD == H - HOUT"
assert XL == 128 and ZLP % 128 == 0


# --------------------------------- kernel ------------------------------------
def resblock_stack_kernel(x_ref, w1_ref, b1_ref, w2_ref, b2_ref, invm_ref,
                          out_ref, carry_ref):
    """One grid step == one ResBlock.  carry_ref holds the activation slab.

    x_ref    : (H, XL)        input slab (consumed at block 0 only)
    w1_ref   : (K*XL, ZLP)    conv1 banded weights, row taps folded into contraction
    b1_ref   : (1, ZLP)       conv1 bias tiled over (n, wo); pad columns are 0
    w2_ref   : (K*ZLP, XL)    conv2 (pconv) banded weights, W padding baked in
    b2_ref   : (1, XL)        conv2 bias tiled over (n, w)
    invm_ref : (H, XL)        1 / avgpool-mask broadcast to the out slab layout
    out_ref  : (H, XL)
    carry_ref: (H, XL) VMEM   activation carried across the block grid axis
    """
    blk = pl.program_id(0)

    @pl.when(blk == 0)
    def _():
        carry_ref[...] = x_ref[...]

    x = carry_ref[...]                                                  # (16, 128)

    # ---- conv1 (valid 3x3, CIN->C2): single 384-deep MXU matmul -------------
    # shifted row copies come from the XLU rotate slot (pltpu.roll), not vld/vst
    xc = jnp.concatenate(
        [x, pltpu.roll(x, H - 1, axis=0), pltpu.roll(x, H - 2, axis=0)], axis=1)
    z = jnp.dot(xc, w1_ref[...], preferred_element_type=jnp.float32)    # (16, 256)
    z = jnp.maximum(z + b1_ref[...], 0.0)

    # Rows h >= HOUT hold wrapped garbage; zero them so they double as conv2's
    # H padding (PAD == H - HOUT asserted at module scope).
    row = jax.lax.broadcasted_iota(jnp.int32, z.shape, 0)
    z = jnp.where(row < HOUT, z, 0.0)

    # ---- conv2 (3x3, padding=2, C2->CIN): single 768-deep MXU matmul --------
    zc = jnp.concatenate(
        [pltpu.roll(z, PAD, axis=0), pltpu.roll(z, PAD - 1, axis=0), z], axis=1)
    acc = jnp.dot(zc, w2_ref[...], preferred_element_type=jnp.float32)  # (16, 128)

    # z2 * (1/mask) + x ; lane-dense (128) store, carried to the next block.
    y = (acc + b2_ref[...]) * invm_ref[...] + x
    carry_ref[...] = y
    out_ref[...] = y.astype(out_ref.dtype)


# ------------------- init-time constants (hoisted out of the forward) --------
def build_stack_constants(blocks_hwio):
    """Banded weights / bias tiles / inverse mask for every block, built once.

    blocks_hwio: list of (w1_hwio (K,K,CIN,C2), b1 (C2,), w2_hwio (K,K,C2,CIN), b2 (CIN,))
    Returns jnp arrays:
      w1cat (NB, K*XL, ZLP), b1t (NB, 1, ZLP), w2cat (NB, K*ZLP, XL),
      b2t (NB, 1, XL), invm (H, XL)
    """
    nb = len(blocks_hwio)
    w1cat = np.zeros((nb, K * XL, ZLP), np.float32)
    w2cat = np.zeros((nb, K * ZLP, XL), np.float32)
    b1t = np.zeros((nb, 1, ZLP), np.float32)
    b2t = np.zeros((nb, 1, XL), np.float32)

    for bi, (w1, b1, w2, b2) in enumerate(blocks_hwio):
        w1 = np.asarray(w1); b1 = np.asarray(b1)
        w2 = np.asarray(w2); b2 = np.asarray(b2)
        for ky in range(K):
            for n in range(N):
                for kx in range(K):
                    # conv1 (valid): input lane wi = wo + kx always in range.
                    for wo in range(WOUT):
                        wi = wo + kx
                        r = ky * XL + n * W * CIN + wi * CIN
                        c = n * WOUT * C2 + wo * C2
                        w1cat[bi, r:r + CIN, c:c + C2] = w1[ky, kx]
                    # conv2 (padding=2 along W baked in as structural zeros).
                    for wo in range(W):
                        wi = wo + kx - PAD
                        if 0 <= wi < WOUT:
                            r = ky * ZLP + n * WOUT * C2 + wi * C2
                            c = n * W * CIN + wo * CIN
                            w2cat[bi, r:r + C2, c:c + CIN] = w2[ky, kx]
        b1t[bi, 0, :ZL] = np.tile(b1, N * WOUT)
        b2t[bi, 0, :] = np.tile(b2, N * W)

    # 1 / avgpool3x3(pad(ones(HOUT, WOUT), PAD)), broadcast to the out slab layout.
    padded = np.zeros((HOUT + 2 * PAD, WOUT + 2 * PAD), np.float32)
    padded[PAD:PAD + HOUT, PAD:PAD + WOUT] = 1.0
    mask = sum(padded[ky:ky + H, kx:kx + W]
               for ky in range(K) for kx in range(K)) / float(K * K)
    inv = 1.0 / mask                                                # (H, W)
    invm = np.tile(np.repeat(inv, CIN, axis=1), (1, N))             # (H, N*W*CIN)

    return (jnp.asarray(w1cat), jnp.asarray(b1t), jnp.asarray(w2cat),
            jnp.asarray(b2t), jnp.asarray(invm))


# ------------------------------- fused forward -------------------------------
@jax.jit
def res_stack_forward(x_nchw, w1cat, b1t, w2cat, b2t, invm):
    """NB stacked ResBlocks, NCHW in / NCHW out.  The slab layout is kept across
    blocks inside ONE pallas_call (grid axis = block index); per-block banded
    weights are streamed via the BlockSpec index_map."""
    nb = w1cat.shape[0]
    # lane-dense slab: rows = h, lanes = n*W*CIN + w*CIN + c   (exactly 128 lanes)
    x_slab = jnp.transpose(x_nchw, (2, 0, 3, 1)).reshape(H, XL)

    out_slab = pl.pallas_call(
        resblock_stack_kernel,
        out_shape=jax.ShapeDtypeStruct((H, XL), jnp.float32),
        grid=(nb,),
        in_specs=[
            pl.BlockSpec((H, XL),             lambda b: (0, 0)),      # x slab
            pl.BlockSpec((None, K * XL, ZLP), lambda b: (b, 0, 0)),   # per-block w1
            pl.BlockSpec((None, 1, ZLP),      lambda b: (b, 0, 0)),   # per-block b1
            pl.BlockSpec((None, K * ZLP, XL), lambda b: (b, 0, 0)),   # per-block w2
            pl.BlockSpec((None, 1, XL),       lambda b: (b, 0, 0)),   # per-block b2
            pl.BlockSpec((H, XL),             lambda b: (0, 0)),      # 1/mask slab
        ],
        out_specs=pl.BlockSpec((H, XL), lambda b: (0, 0)),
        scratch_shapes=[pltpu.VMEM((H, XL), jnp.float32)],            # activation carry
        compiler_params=pltpu.CompilerParams(
            dimension_semantics=("arbitrary",)),   # blocks are sequential (carried state)
    )(x_slab, w1cat, b1t, w2cat, b2t, invm)

    return jnp.transpose(out_slab.reshape(H, N, W, CIN), (1, 3, 0, 2))


# ----------------------------- reference & test ------------------------------
def make_block_params(key, zero_pconv=True):
    """Deterministic parameters following ResBlock.__init__ semantics."""
    k1, k2, k3, k4 = jax.random.split(key, 4)
    # wn_conv: weight_v random, weight_g fixed to ones -> w = v / ||v|| per out-ch.
    v = jax.random.normal(k1, (C2, CIN, K, K), jnp.float32)             # OIHW
    w1_oihw = v / jnp.sqrt(jnp.sum(v * v, axis=(1, 2, 3), keepdims=True))
    b1 = 0.1 * jax.random.normal(k2, (C2,), jnp.float32)
    # pconv: weight filled with 0 (per __init__); nonzero variant for robustness.
    if zero_pconv:
        w2_oihw = jnp.zeros((CIN, C2, K, K), jnp.float32)
    else:
        w2_oihw = 0.05 * jax.random.normal(k4, (CIN, C2, K, K), jnp.float32)
    b2 = 0.1 * jax.random.normal(k3, (CIN,), jnp.float32)
    w1_hwio = jnp.transpose(w1_oihw, (2, 3, 1, 0))                      # (K,K,CIN,C2)
    w2_hwio = jnp.transpose(w2_oihw, (2, 3, 1, 0))                      # (K,K,C2,CIN)
    return (w1_hwio, b1, w2_hwio, b2)


def reference_forward(x_nchw, blocks_hwio):
    """Pure-JAX reference for the ResBlock stack, NCHW in / NCHW out."""
    hp = jax.lax.Precision.HIGHEST
    dn = ('NHWC', 'HWIO', 'NHWC')
    padded = jnp.zeros((HOUT + 2 * PAD, WOUT + 2 * PAD), jnp.float32)
    padded = padded.at[PAD:PAD + HOUT, PAD:PAD + WOUT].set(1.0)
    mask = sum(padded[ky:ky + H, kx:kx + W]
               for ky in range(K) for kx in range(K)) / float(K * K)

    x = jnp.transpose(x_nchw, (0, 2, 3, 1))                             # NHWC
    for (w1, b1, w2, b2) in blocks_hwio:
        z = jax.lax.conv_general_dilated(x, w1, (1, 1), 'VALID',
                                         dimension_numbers=dn, precision=hp) + b1
        z = jnp.maximum(z, 0.0)
        z2 = jax.lax.conv_general_dilated(z, w2, (1, 1),
                                          [(PAD, PAD), (PAD, PAD)],
                                          dimension_numbers=dn, precision=hp) + b2
        x = z2 / mask[None, :, :, None] + x
    return jnp.transpose(x, (0, 3, 1, 2))


if __name__ == "__main__":
    key = jax.random.PRNGKey(0)
    kx, *kb = jax.random.split(key, 1 + 2 * NB)

    # Module consumes NCHW.
    x_nchw = jax.random.normal(kx, (N, CIN, H, W), jnp.float32)

    # Faithful-to-__init__ stack (pconv weights are zero).
    blocks = [make_block_params(kb[i], zero_pconv=True) for i in range(NB)]
    consts = build_stack_constants(blocks)          # hoisted: built once at init
    out = jax.block_until_ready(res_stack_forward(x_nchw, *consts))
    ref = reference_forward(x_nchw, blocks)
    assert out.shape == (N, CIN, H, W)
    assert jnp.allclose(out, ref, atol=1e-4, rtol=1e-4), \
        f"max abs diff {jnp.max(jnp.abs(out - ref))}"

    # Robustness check of the general pconv path with nonzero (trained) weights.
    blocks_nz = [make_block_params(kb[NB + i], zero_pconv=False) for i in range(NB)]
    consts_nz = build_stack_constants(blocks_nz)
    out_nz = jax.block_until_ready(res_stack_forward(x_nchw, *consts_nz))
    ref_nz = reference_forward(x_nchw, blocks_nz)
    assert jnp.allclose(out_nz, ref_nz, atol=5e-3, rtol=5e-3), \
        f"max abs diff {jnp.max(jnp.abs(out_nz - ref_nz))}"

    print("KERNEL_OK")
</pallas_src>

<mosaic_0001>
module attributes {stable_mosaic.version = 11 : i64} {
  func.func @resblock_stack_kernel(%arg0: i32, %arg1: memref<16x128xf32, #tpu.memory_space<vmem>>, %arg2: memref<1x384x256xf32, #tpu.memory_space<vmem>>, %arg3: memref<1x1x256xf32, #tpu.memory_space<vmem>>, %arg4: memref<1x768x128xf32, #tpu.memory_space<vmem>>, %arg5: memref<1x1x128xf32, #tpu.memory_space<vmem>>, %arg6: memref<16x128xf32, #tpu.memory_space<vmem>>, %arg7: memref<16x128xf32, #tpu.memory_space<vmem>>, %arg8: memref<16x128xf32, #tpu.memory_space<vmem>>) attributes {dimension_semantics = [#tpu.dimension_semantics<arbitrary>], iteration_bounds = array<i64: 3>, scalar_prefetch = 0 : i64, scratch_operands = 1 : i64, tpu.core_type = #tpu.core_type<tc>, window_params = [{pipeline_mode = #tpu.pipeline_mode<synchronous>, transform_indices = @transform_0, window_bounds = array<i64: 16, 128>}, {transform_indices = @transform_1, window_bounds = array<i64: 1, 384, 256>}, {transform_indices = @transform_2, window_bounds = array<i64: 1, 1, 256>}, {transform_indices = @transform_3, window_bounds = array<i64: 1, 768, 128>}, {transform_indices = @transform_4, window_bounds = array<i64: 1, 1, 128>}, {pipeline_mode = #tpu.pipeline_mode<synchronous>, transform_indices = @transform_5, window_bounds = array<i64: 16, 128>}, {pipeline_mode = #tpu.pipeline_mode<synchronous>, transform_indices = @transform_6, window_bounds = array<i64: 16, 128>}]} {
    %c0_i32 = arith.constant 0 : i32
    %0 = arith.cmpi eq, %arg0, %c0_i32 : i32
    %1 = arith.extui %0 : i1 to i32
    %c0_i32_0 = arith.constant 0 : i32
    %2 = arith.cmpi ne, %1, %c0_i32_0 : i32
    scf.if %2 {
      %c0_24 = arith.constant 0 : index
      %c0_25 = arith.constant 0 : index
      %36 = vector.load %arg1[%c0_24, %c0_25] : memref<16x128xf32, #tpu.memory_space<vmem>>, vector<16x128xf32>
      %c0_26 = arith.constant 0 : index
      %c0_27 = arith.constant 0 : index
      %37 = vector.load %arg8[%c0_26, %c0_27] : memref<16x128xf32, #tpu.memory_space<vmem>>, vector<16x128xf32>
      tpu.vector_store %arg8[%c0_26, %c0_27], %36 {strides = array<i32>} : memref<16x128xf32, #tpu.memory_space<vmem>>, vector<16x128xf32>,
    } else {
    }
    %c0 = arith.constant 0 : index
    %c0_1 = arith.constant 0 : index
    %3 = vector.load %arg8[%c0, %c0_1] : memref<16x128xf32, #tpu.memory_space<vmem>>, vector<16x128xf32>
    %c15_i32 = arith.constant 15 : i32
    %4 = tpu.dynamic_rotate %3 by %c15_i32 dim 0 : vector<16x128xf32>, i32 -> vector<16x128xf32>
    %c14_i32 = arith.constant 14 : i32
    %5 = tpu.dynamic_rotate %3 by %c14_i32 dim 0 : vector<16x128xf32>, i32 -> vector<16x128xf32>
    %6 = tpu.concatenate %3, %4, %5 in 1 : vector<16x128xf32>, vector<16x128xf32>, vector<16x128xf32> -> vector<16x384xf32>
    %c0_2 = arith.constant 0 : index
    %c0_3 = arith.constant 0 : index
    %c0_4 = arith.constant 0 : index
    %7 = vector.load %arg2[%c0_2, %c0_3, %c0_4] : memref<1x384x256xf32, #tpu.memory_space<vmem>>, vector<1x384x256xf32>
    %8 = vector.shape_cast %7 : vector<1x384x256xf32> to vector<384x256xf32>
    %cst = arith.constant dense<0.000000e+00> : vector<16x256xf32>
    %9 = tpu.matmul %6, %8, %cst {dimension_numbers = #tpu.dot_dimension_numbers<[1], [0], [0], [1], [0, 0, 1, 1], [], []>} : vector<16x384xf32>, vector<384x256xf32>, vector<16x256xf32> -> vector<16x256xf32>
    %c0_5 = arith.constant 0 : index
    %c0_6 = arith.constant 0 : index
    %c0_7 = arith.constant 0 : index
    %10 = vector.load %arg3[%c0_5, %c0_6, %c0_7] : memref<1x1x256xf32, #tpu.memory_space<vmem>>, vector<1x1x256xf32>
    %11 = vector.shape_cast %10 : vector<1x1x256xf32> to vector<1x256xf32>
    %12 = vector.broadcast %11 : vector<1x256xf32> to vector<16x256xf32>
    %13 = arith.addf %9, %12 : vector<16x256xf32>
    %cst_8 = arith.constant 0.000000e+00 : f32
    %14 = vector.broadcast %cst_8 : f32 to vector<16x256xf32>
    %15 = arith.maximumf %13, %14 : vector<16x256xf32>
    %16 = tpu.iota {dimensions = array<i32: 0>} : vector<16x256xi32>
    %c14_i32_9 = arith.constant 14 : i32
    %17 = vector.broadcast %c14_i32_9 : i32 to vector<16x256xi32>
    %18 = arith.cmpi slt, %16, %17 : vector<16x256xi32>
    %cst_10 = arith.constant 0.000000e+00 : f32
    %19 = vector.broadcast %cst_10 : f32 to vector<16x256xf32>
    %20 = arith.select %18, %15, %19 : vector<16x256xi1>, vector<16x256xf32>
    %c2_i32 = arith.constant 2 : i32
    %21 = tpu.dynamic_rotate %20 by %c2_i32 dim 0 : vector<16x256xf32>, i32 -> vector<16x256xf32>
    %c1_i32 = arith.constant 1 : i32
    %22 = tpu.dynamic_rotate %20 by %c1_i32 dim 0 : vector<16x256xf32>, i32 -> vector<16x256xf32>
    %23 = tpu.concatenate %21, %22, %20 in 1 : vector<16x256xf32>, vector<16x256xf32>, vector<16x256xf32> -> vector<16x768xf32>
    %c0_11 = arith.constant 0 : index
    %c0_12 = arith.constant 0 : index
    %c0_13 = arith.constant 0 : index
    %24 = vector.load %arg4[%c0_11, %c0_12, %c0_13] : memref<1x768x128xf32, #tpu.memory_space<vmem>>, vector<1x768x128xf32>
    %25 = vector.shape_cast %24 : vector<1x768x128xf32> to vector<768x128xf32>
    %cst_14 = arith.constant dense<0.000000e+00> : vector<16x128xf32>
    %26 = tpu.matmul %23, %25, %cst_14 {dimension_numbers = #tpu.dot_dimension_numbers<[1], [0], [0], [1], [0, 0, 1, 1], [], []>} : vector<16x768xf32>, vector<768x128xf32>, vector<16x128xf32> -> vector<16x128xf32>
    %c0_15 = arith.constant 0 : index
    %c0_16 = arith.constant 0 : index
    %c0_17 = arith.constant 0 : index
    %27 = vector.load %arg5[%c0_15, %c0_16, %c0_17] : memref<1x1x128xf32, #tpu.memory_space<vmem>>, vector<1x1x128xf32>
    %28 = vector.shape_cast %27 : vector<1x1x128xf32> to vector<1x128xf32>
    %29 = vector.broadcast %28 : vector<1x128xf32> to vector<16x128xf32>
    %30 = arith.addf %26, %29 : vector<16x128xf32>
    %c0_18 = arith.constant 0 : index
    %c0_19 = arith.constant 0 : index
    %31 = vector.load %arg6[%c0_18, %c0_19] : memref<16x128xf32, #tpu.memory_space<vmem>>, vector<16x128xf32>
    %32 = arith.mulf %30, %31 : vector<16x128xf32>
    %33 = arith.addf %32, %3 : vector<16x128xf32>
    %c0_20 = arith.constant 0 : index
    %c0_21 = arith.constant 0 : index
    %34 = vector.load %arg8[%c0_20, %c0_21] : memref<16x128xf32, #tpu.memory_space<vmem>>, vector<16x128xf32>
    tpu.vector_store %arg8[%c0_20, %c0_21], %33 {strides = array<i32>} : memref<16x128xf32, #tpu.memory_space<vmem>>, vector<16x128xf32>,
    %c0_22 = arith.constant 0 : index
    %c0_23 = arith.constant 0 : index
    %35 = vector.load %arg7[%c0_22, %c0_23] : memref<16x128xf32, #tpu.memory_space<vmem>>, vector<16x128xf32>
    tpu.vector_store %arg7[%c0_22, %c0_23], %33 {strides = array<i32>} : memref<16x128xf32, #tpu.memory_space<vmem>>, vector<16x128xf32>,
    return
  }
  func.func @transform_0(%arg0: i32) -> (i32, i32) {
    %c0_i32 = arith.constant 0 : i32
    %c0_i32_0 = arith.constant 0 : i32
    %c0_i32_1 = arith.constant 0 : i32
    return %c0_i32, %c0_i32_0 : i32, i32
  }
  func.func @transform_1(%arg0: i32) -> (i32, i32, i32) {
    %c0_i32 = arith.constant 0 : i32
    %c0_i32_0 = arith.constant 0 : i32
    %c0_i32_1 = arith.constant 0 : i32
    return %arg0, %c0_i32, %c0_i32_0 : i32, i32, i32
  }
  func.func @transform_2(%arg0: i32) -> (i32, i32, i32) {
    %c0_i32 = arith.constant 0 : i32
    %c0_i32_0 = arith.constant 0 : i32
    %c0_i32_1 = arith.constant 0 : i32
    return %arg0, %c0_i32, %c0_i32_0 : i32, i32, i32
  }
  func.func @transform_3(%arg0: i32) -> (i32, i32, i32) {
    %c0_i32 = arith.constant 0 : i32
    %c0_i32_0 = arith.constant 0 : i32
    %c0_i32_1 = arith.constant 0 : i32
    return %arg0, %c0_i32, %c0_i32_0 : i32, i32, i32
  }
  func.func @transform_4(%arg0: i32) -> (i32, i32, i32) {
    %c0_i32 = arith.constant 0 : i32
    %c0_i32_0 = arith.constant 0 : i32
    %c0_i32_1 = arith.constant 0 : i32
    return %arg0, %c0_i32, %c0_i32_0 : i32, i32, i32
  }
  func.func @transform_5(%arg0: i32) -> (i32, i32) {
    %c0_i32 = arith.constant 0 : i32
    %c0_i32_0 = arith.constant 0 : i32
    %c0_i32_1 = arith.constant 0 : i32
    return %c0_i32, %c0_i32_0 : i32, i32
  }
  func.func @transform_6(%arg0: i32) -> (i32, i32) {
    %c0_i32 = arith.constant 0 : i32
    %c0_i32_0 = arith.constant 0 : i32
    %c0_i32_1 = arith.constant 0 : i32
    return %c0_i32, %c0_i32_0 : i32, i32
  }
}

</mosaic_0001>

<bundles_post_ra>
// kernel: res_stack_forward.1
= control target key start
LH: loop header
LB: loop body
LE: loop exit
PB: predicated region body
PF: predicated region fallthrough
CT: control target
= control target key end

     0   :  { %s2368_s0 = inlined_call_operand.vmem [shape: f32[16,128], index: 0, kind: input, shape index: {}]   ;;  %s2369_s1 = inlined_call_operand.hbm [shape: f32[3,384,256], index: 1, kind: input, shape index: {}]   ;;  %s2370_s2 = inlined_call_operand.hbm [shape: f32[3,1,256], index: 2, kind: input, shape index: {}]   ;;  %s2371_s3 = inlined_call_operand.hbm [shape: f32[3,768,128], index: 3, kind: input, shape index: {}]   ;;  %s2372_s4 = inlined_call_operand.hbm [shape: f32[3,1,128], index: 4, kind: input, shape index: {}]   ;;  %s2373_s5 = inlined_call_operand.hbm [shape: f32[16,128], index: 5, kind: input, shape index: {}]   ;;  %s2374_s6 = inlined_call_operand.vmem [shape: f32[16,128], index: 6, kind: output, shape index: {}]  }
   0x1   :  { %2383 = sst [smem:[#allocation16_spill]] %s2369_s1 }
   0x2   :  { %2384 = sst [smem:[#allocation17_spill]] %s2370_s2 }
   0x3   :  { %2385 = sst [smem:[#allocation18_spill]] %s2373_s5 }
   0x4   :  { %11 = vsyncpa [#allocation4], 0 }
   0x5   :  { %13 = vsyncpa [#allocation4 + $0x1], 0 }
   0x6   :  { %14 = vsyncpa [#allocation6], 0 }
   0x7   :  { %16 = vsyncpa [#allocation6 + $0x1], 0 }
   0x8   :  { %17 = vsyncpa [#allocation9], 0 }
   0x9   :  { %19 = vsyncpa [#allocation9 + $0x1], 0  ;;  %s1792_s21 = smov 0   ;;  %s1794_s22 = smov 0  }
   0xa   :  { %s1796_s23 = smov 0   ;;  %s1798_s24 = smov 0  }
   0xb LB: > { %s1811_s25 = sadd.s32 4294967295, %s1745_s24   ;;  %p66_p0 = scmp.ne.s32.totalorder %s1737_s22, %s1733_s21  ;;  %s1745_s24 = sphi %s1798_s24, %s2409_s24   ;;  %s1741_s23 = sphi %s1796_s23, %s2408_s23   ;;  %s1737_s22 = sphi %s1794_s22, %s2407_s22   ;;  %s1733_s21 = sphi %s1792_s21, %s2406_s21  }
   0xc   : > { %p2375_p1 = scmp.eq.s32.totalorder %s1811_s25, 0  ;;  %p1143_p2 = scmp.ge.s32.totalorder %s1745_s24, 1 }
   0xd   : > { %p197_p3 = scmp.lt.s32.totalorder %s1745_s24, 4  ;;  %s1747_s28 = smov [#allocation10]  }
   0xe   : > { %p1820_p5 = por %p2375_p1, %p66_p0  ;;  %s212_s29 = sshll.u32 %s1747_s28, 4  ;;  %s213_s29 = int_to_ptr.vmem [resolvable:$true] %s212_s29 }
   0xf   : > { %p1824_p6 = pnand %p1143_p2, %p197_p3  ;;  %s1837_s7 = sadd.s32 1, %s1745_s24  }
  0x10   : > { %s2386_s26 = scalar_select %p1820_p5, 1, 0 }
  0x11   : > { %s2387_s27 = scalar_select %p1824_p6, 1, 0 }
  0x12   : > { %p1493_p7 = pneg %p1824_p6  ;;  %s53_s8 = sadd.s32 1, %s1741_s23 }
  0x13   : > { %s50_s9 = ssub.s32 %s1745_s24, %s1837_s7  ;;  %s2389_s5 = sld [smem:[#allocation18_spill]] }
  0x14   : > { %p1832_p8 = pnand %p1493_p7, %p2375_p1 }
  0x16   : > { %p1553_p10 = pneg %p1832_p8 }
  0x19   : > { %s1551_s12 = scalar_lea.hbm %s2389_s5, 256 }
  0x1a   : > { %p1552_p9 = scmp.ne.s32.totalorder %s2389_s5, %s1551_s12  ;;  %p1558_p13 = scmp.lt.u32.totalorder %s1551_s12, %s2389_s5 }
  0x1c   : > { %p1554_p11 = pnand %p1553_p10, %p1552_p9 }
  0x1e   : > { %p1555_p12 = pneg %p1554_p11 }
  0x20   : > { %p1560_p0 = pnand %p1558_p13, %p1555_p12 }
  0x22   : > { %1563 = shalt.err (!%p1560_p0)
}
  0x23   : > { %s1564_s17 = scalar_lea.vmem %s213_s29, 256  ;;  %p1572_p4 = scmp.lt.s32.totalorder %s213_s29, %s213_s29 }
  0x24   : > { %p1565_p2 = scmp.ne.s32.totalorder %s213_s29, %s1564_s17  ;;  %p1573_p1 = scmp.lt.s32.totalorder %s1564_s17, %s1564_s17 }
  0x26   : > { %p1567_p3 = pnand %p1565_p2, %p1553_p10  ;;  %p1574_p5 = por %p1573_p1, %p1572_p4 }
  0x28   : > { %p1568_p7 = pneg %p1567_p3 }
  0x2a   : > { %p1575_p6 = pnand %p1574_p5, %p1568_p7 }
  0x2c   : > { %1578 = shalt.err (!%p1575_p6)
}
  0x2d   : > { %s2379_s18 = smov 128   ;;  %s2380_s19 = smov 8  }
  0x2e   : > { %1496 = dma.hbm_to_vmem [thread:$0]  (!%p1832_p8), %s2389_s5, 256, %s213_s29, [#allocation9], %s2379_s18, %s2379_s18, %s2380_s19  }
  0x2f   : > { %p51_p1 = scmp.eq.s32.totalorder %s50_s9, 0  ;;  %p60_p4 = scmp.ne.s32.totalorder %s1741_s23, %s1737_s22 }
  0x30   : > { %p61_p5 = scmp.eq.s32.totalorder %s1745_s24, 0  ;;  %p1511_p6 = scmp.lt.s32.totalorder %s1745_s24, 3 }
  0x31   : > { %s1866_s28 = scalar_select %p51_p1, %s1741_s23, %s53_s8  }
  0x32   : > { %p62_p9 = por %p61_p5, %p60_p4  ;;  %s1869_s10 = sand.u32 1, %s1741_s23  }
  0x33   : > { %2390 = sst [smem:[#allocation15_spill]] %s1866_s28  ;;  %s2378_s11 = sand.u32 1, %s1745_s24  }
  0x34   : > { %s1147_s30 = sshll.u32 %s1869_s10, 1  ;;  %p1873_p10 = pnand %p1511_p6, %p62_p9 }
  0x35   : > { %s1161_s13 = sshll.u32 %s1745_s24, 5  ;;  %s2392_s2 = sld [smem:[#allocation17_spill]] }
  0x36   : > { %s2391_s12 = scalar_select %p1873_p10, 1, 0 }
  0x37   : > { %s251_s8 = scalar_lea.vmem [#allocation5], %s1147_s30  ;;  %s1887_s16 = scalar_lea.sflag [#allocation6], %s2378_s11 }
  0x38   : > { %s259_s15 = sshll.u32 %s251_s8, 4  ;;  %p1893_p11 = pneg %p1873_p10  ;;  %s1883_s15 = int_to_ptr.vmem [resolvable:$true] %s259_s15 }
  0x3b   : > { %s1881_s9 = scalar_lea.hbm %s2392_s2, %s1161_s13  ;;  %s1584_s30 = scalar_lea.hbm %s2392_s2, 96 }
  0x3c   : > { %s1579_s17 = scalar_lea.hbm %s1881_s9, 32  ;;  %p1585_p0 = scmp.lt.u32.totalorder %s1881_s9, %s2392_s2 }
  0x3d   : > { %p1580_p8 = scmp.ne.s32.totalorder %s1881_s9, %s1579_s17  ;;  %p1586_p2 = scmp.lt.u32.totalorder %s1584_s30, %s1579_s17 }
  0x3e   : > { %p1588_p7 = scmp.lt.u32.totalorder %s1579_s17, %s1881_s9 }
  0x3f   : > { %p1582_p12 = pnand %p1893_p11, %p1580_p8  ;;  %p1587_p3 = por %p1586_p2, %p1585_p0 }
  0x41   : > { %p1583_p13 = pneg %p1582_p12  ;;  %p1589_p1 = por %p1588_p7, %p1587_p3 }
  0x43   : > { %p1590_p4 = pnand %p1589_p1, %p1583_p13 }
  0x45   : > { %1593 = shalt.err (!%p1590_p4)
}
  0x46   : > { %s1594_s8 = scalar_lea.vmem %s1883_s15, 32  ;;  %s1750_s21 = smov [#allocation5]  }
  0x47   : > { %p1595_p5 = scmp.ne.s32.totalorder %s1883_s15, %s1594_s8  ;;  %s1599_s13 = sshll.u32 %s1750_s21, 4  ;;  %s1600_s13 = int_to_ptr.vmem [resolvable:$false] %s1599_s13 }
  0x48   : > { %s1601_s29 = scalar_lea.vmem %s1600_s13, 64  ;;  %p1602_p8 = scmp.lt.s32.totalorder %s1883_s15, %s1600_s13 }
  0x49   : > { %p1597_p6 = pnand %p1595_p5, %p1893_p11  ;;  %p1603_p12 = scmp.lt.s32.totalorder %s1601_s29, %s1594_s8 }
  0x4b   : > { %p1598_p9 = pneg %p1597_p6  ;;  %p1604_p0 = por %p1603_p12, %p1602_p8 }
  0x4d   : > { %p1605_p2 = pnand %p1604_p0, %p1598_p9 }
  0x4f   : > { %1608 = shalt.err (!%p1605_p2)
}
  0x50   : > { %1503 = dma.hbm_to_vmem [thread:$0]  (!%p1873_p10), %s1881_s9, 32, %s1883_s15, %s1887_s16  }
  0x51   : > { %s2381_s17 = smul.u32 768, %s1869_s10  ;;  %s2394_s1 = sld [smem:[#allocation16_spill]] }
  0x52   : > { %s1477_s30 = smul.u32 12288, %s1745_s24  ;;  %s227_s15 = scalar_lea.sflag [#allocation4], %s1869_s10 }
  0x53   : > { %s230_s13 = scalar_lea.vmem [#allocation3], %s2381_s17 }
  0x54   : > { %s237_s29 = sshll.u32 %s230_s13, 4  ;;  %s1931_s9 = scalar_lea.hbm %s2371_s3, %s1477_s30  ;;  %s1926_s29 = int_to_ptr.vmem [resolvable:$true] %s237_s29 }
  0x57   : > { %s1922_s8 = scalar_lea.hbm %s2394_s1, %s1477_s30  ;;  %s1614_s2 = scalar_lea.hbm %s2394_s1, 36864 }
  0x58   : > { %s1609_s19 = scalar_lea.hbm %s1922_s8, 12288  ;;  %p1615_p1 = scmp.lt.u32.totalorder %s1922_s8, %s2394_s1 }
  0x59   : > { %p1610_p13 = scmp.ne.s32.totalorder %s1922_s8, %s1609_s19  ;;  %p1616_p4 = scmp.lt.u32.totalorder %s1614_s2, %s1609_s19 }
  0x5a   : > { %p1618_p6 = scmp.lt.u32.totalorder %s1609_s19, %s1922_s8 }
  0x5b   : > { %p1612_p3 = pnand %p1610_p13, %p1893_p11  ;;  %p1617_p5 = por %p1616_p4, %p1615_p1 }
  0x5d   : > { %p1613_p7 = pneg %p1612_p3  ;;  %p1619_p9 = por %p1618_p6, %p1617_p5 }
  0x5f   : > { %p1620_p8 = pnand %p1619_p9, %p1613_p7 }
  0x61   : > { %1623 = shalt.err (!%p1620_p8)
}
  0x62   : > { %s1624_s18 = scalar_lea.vmem %s1926_s29, 12288  ;;  %s1751_s11 = smov [#allocation3]  }
  0x63   : > { %p1625_p12 = scmp.ne.s32.totalorder %s1926_s29, %s1624_s18  ;;  %s1629_s30 = sshll.u32 %s1751_s11, 4  ;;  %s1630_s30 = int_to_ptr.vmem [resolvable:$false] %s1629_s30 }
  0x64   : > { %s1631_s5 = scalar_lea.vmem %s1630_s30, 24576  ;;  %p1632_p13 = scmp.lt.s32.totalorder %s1926_s29, %s1630_s30 }
  0x65   : > { %p1627_p0 = pnand %p1625_p12, %p1893_p11  ;;  %p1633_p3 = scmp.lt.s32.totalorder %s1631_s5, %s1624_s18 }
  0x67   : > { %p1628_p2 = pneg %p1627_p0  ;;  %p1634_p1 = por %p1633_p3, %p1632_p13 }
  0x69   : > { %p1635_p4 = pnand %p1634_p1, %p1628_p2 }
  0x6b   : > { %1638 = shalt.err (!%p1635_p4)
}
  0x6c   : > { %s1752_s2 = smov 256   ;;  %s1753_s19 = smov 16  }
  0x6d   : > { %1500 = dma.hbm_to_vmem [thread:$0]  (!%p1873_p10), %s1922_s8, 12288, %s1926_s29, %s227_s15, %s1752_s2, %s1752_s2, %s1753_s19  }
  0x6e   : > { %s2395_s17 = smul.u32 768, %s1869_s10  ;;  %s1151_s21 = sshll.u32 %s1745_s24, 4 }
  0x6f   : > { %s1639_s18 = scalar_lea.hbm %s1931_s9, 12288  ;;  %s1644_s5 = scalar_lea.hbm %s2371_s3, 36864 }
  0x70   : > { %s270_s13 = scalar_lea.vmem [#allocation7], %s2395_s17  ;;  %p1640_p7 = scmp.ne.s32.totalorder %s1931_s9, %s1639_s18 }
  0x71   : > { %s277_s14 = sshll.u32 %s270_s13, 4  ;;  %p1645_p9 = scmp.lt.u32.totalorder %s1931_s9, %s2371_s3  ;;  %s1959_s14 = int_to_ptr.vmem [resolvable:$true] %s277_s14 }
  0x72   : > { %p1642_p5 = pnand %p1640_p7, %p1893_p11  ;;  %p1646_p8 = scmp.lt.u32.totalorder %s1644_s5, %s1639_s18 }
  0x73   : > { %p1648_p0 = scmp.lt.u32.totalorder %s1639_s18, %s1931_s9 }
  0x74   : > { %p1643_p6 = pneg %p1642_p5  ;;  %p1647_p12 = por %p1646_p8, %p1645_p9 }
  0x76   : > { %p1649_p2 = por %p1648_p0, %p1647_p12 }
  0x78   : > { %p1650_p13 = pnand %p1649_p2, %p1643_p6 }
  0x7a   : > { %1653 = shalt.err (!%p1650_p13)
}
  0x7b   : > { %s1654_s8 = scalar_lea.vmem %s1959_s14, 12288  ;;  %s1754_s29 = smov [#allocation7]  }
  0x7c   : > { %p1655_p3 = scmp.ne.s32.totalorder %s1959_s14, %s1654_s8  ;;  %s1659_s15 = sshll.u32 %s1754_s29, 4  ;;  %s1660_s15 = int_to_ptr.vmem [resolvable:$false] %s1659_s15 }
  0x7d   : > { %s1661_s1 = scalar_lea.vmem %s1660_s15, 24576  ;;  %p1662_p7 = scmp.lt.s32.totalorder %s1959_s14, %s1660_s15 }
  0x7e   : > { %p1657_p1 = pnand %p1655_p3, %p1893_p11  ;;  %p1663_p5 = scmp.lt.s32.totalorder %s1661_s1, %s1654_s8 }
  0x80   : > { %p1658_p4 = pneg %p1657_p1  ;;  %p1664_p9 = por %p1663_p5, %p1662_p7 }
  0x82   : > { %p1665_p8 = pnand %p1664_p9, %p1658_p4 }
  0x84   : > { %1668 = shalt.err (!%p1665_p8)
}
  0x85   : > { %s2396_s28 = smov 8   ;;  %s2397_s2 = smov 128  }
  0x86   : > { %1506 = dma.hbm_to_vmem [thread:$0]  (!%p1873_p10), %s1931_s9, 12288, %s1959_s14, %s1887_s16, %s2397_s2, %s2397_s2, %s2396_s28  }
  0x87   : > { %s1992_s13 = scalar_lea.hbm %s2372_s4, %s1151_s21  ;;  %s290_s18 = scalar_lea.vmem [#allocation8], %s1869_s10 }
  0x88   : > { %s297_s11 = sshll.u32 %s290_s18, 4  ;;  %s2398_s30 = sand.u32 1, %s1745_s24   ;;  %s298_s11 = int_to_ptr.vmem [resolvable:$true] %s297_s11 }
  0x89   : > { %s288_s5 = scalar_lea.sflag [#allocation9], %s2398_s30  ;;  %s1669_s8 = scalar_lea.hbm %s1992_s13, 16 }
  0x8a   : > { %p1670_p6 = scmp.ne.s32.totalorder %s1992_s13, %s1669_s8  ;;  %s1674_s14 = scalar_lea.hbm %s2372_s4, 48 }
  0x8b   : > { %p1675_p2 = scmp.lt.u32.totalorder %s1992_s13, %s2372_s4  ;;  %p1676_p13 = scmp.lt.u32.totalorder %s1674_s14, %s1669_s8 }
  0x8c   : > { %p1672_p12 = pnand %p1670_p6, %p1893_p11  ;;  %p1678_p1 = scmp.lt.u32.totalorder %s1669_s8, %s1992_s13 }
  0x8d   : > { %p1677_p3 = por %p1676_p13, %p1675_p2 }
  0x8e   : > { %p1673_p0 = pneg %p1672_p12 }
  0x8f   : > { %p1679_p4 = por %p1678_p1, %p1677_p3 }
  0x91   : > { %p1680_p7 = pnand %p1679_p4, %p1673_p0 }
  0x93   : > { %1683 = shalt.err (!%p1680_p7)
}
  0x94   : > { %s1684_s24 = scalar_lea.vmem %s298_s11, 16  ;;  %s1755_s10 = smov [#allocation8]  }
  0x95   : > { %p1685_p5 = scmp.ne.s32.totalorder %s298_s11, %s1684_s24  ;;  %s1689_s15 = sshll.u32 %s1755_s10, 4  ;;  %s1690_s15 = int_to_ptr.vmem [resolvable:$false] %s1689_s15 }
  0x96   : > { %s1691_s1 = scalar_lea.vmem %s1690_s15, 32  ;;  %p1692_p6 = scmp.lt.s32.totalorder %s298_s11, %s1690_s15 }
  0x97   : > { %p1687_p9 = pnand %p1685_p5, %p1893_p11  ;;  %p1693_p12 = scmp.lt.s32.totalorder %s1691_s1, %s1684_s24 }
  0x99   : > { %p1688_p8 = pneg %p1687_p9  ;;  %p1694_p10 = por %p1693_p12, %p1692_p6 }
  0x9b   : > { %p1695_p2 = pnand %p1694_p10, %p1688_p8 }
  0x9d   : > { %1698 = shalt.err (!%p1695_p2)
}
  0x9e   : > { %p2399_p13 = scmp.ne.s32.totalorder %s2391_s12, 0  ;;  %p2400_p0 = scmp.ne.s32.totalorder %s2387_s27, 0 }
  0x9f   : > { %s2017_s20 = sand.u32 (!%p2400_p0), 1, %s1737_s22   ;;  %p2401_p11 = scmp.ne.s32.totalorder (!%p2400_p0), %s2386_s26, 0 }
  0xa0   : > { %1509 = dma.hbm_to_vmem [thread:$0]  (!%p2399_p13), %s1992_s13, 16, %s298_s11, %s288_s5  }
  0xa1   : > { %306 = sbr.rel (%p2400_p0) target bundleno = 802 (0x322), region = 44  ;;  %s309_s2 = scalar_lea.sflag (!%p2400_p0), [#allocation4], %s2017_s20 }
  0xa2   : > { %s1480_s28 = smul.u32 (!%p2400_p0), 768, %s2017_s20 }
  0xa4   : > { %s2021_s19 = scalar_lea.vmem (!%p2400_p0), [#allocation3], %s1480_s28 }
  0xa8   : > { %1716 = dma.done.wait (%p2401_p11), %s309_s2, 12288  }
  0xa9   : > { %1718 = vsyncadd (%p2401_p11), %s309_s2, 4294955008  ;;  %s317_s27 = sand.u32 1, %s1811_s25   ;;  %s1153_s12 = sshll.u32 %s2017_s20, 1 }
  0xaa   : > { %s318_s17 = scalar_lea.sflag [#allocation6], %s317_s27  ;;  %s2029_s13 = scalar_lea.vmem [#allocation5], %s1153_s12 }
  0xab   : > { %1720 = dma.done.wait (%p2401_p11), %s318_s17, 12320  }
  0xac   : > { %1722 = vsyncadd (%p2401_p11), %s318_s17, 4294954976  ;;  %s2035_s18 = scalar_lea.vmem [#allocation7], %s1480_s28  ;;  %s336_s11 = scalar_lea.sflag [#allocation9], %s317_s27 }
  0xad   : > { %s338_s30 = scalar_lea.vmem [#allocation8], %s2017_s20 }
  0xae   : > { %1724 = dma.done.wait (%p2401_p11), %s336_s11, 16  }
  0xaf   : > { %1726 = vsyncadd (%p2401_p11), %s336_s11, 4294967280  ;;  %p2402_p10 = scmp.eq.s32.totalorder %s1811_s25, 0 }
  0xb1   : > { %1728 = dma.done.wait (%p2402_p10), [#allocation9], 256   ;;  %p2403_p3 = pmov %p2402_p10 }
  0xb2   : > { %p2404_p1 = scmp.ne.s32.totalorder %s1811_s25, 0 }
  0xb3   : > { %1730 = vsyncadd (%p2403_p3), [#allocation9], 4294967040  ;;  %v384_v0 = vld [vmem:[%s2368_s0] sm:$0xff] (!%p2404_p1)  ;;  %v385_v1 = vld [vmem:[%s2368_s0 + $0x8] sm:$0xff] (!%p2404_p1) }
  0xb4   : > { %383 = sbr.rel (%p2404_p1) target bundleno = 187 (0xbb), region = 68  ;;  %386 = vst [vmem:[#allocation2] sm:$0xff] (!%p2404_p1), %v384_v0  ;;  %387 = vst [vmem:[#allocation2 + $0x8] sm:$0xff] (!%p2404_p1), %v385_v1 }
  0xbb PF: > { %v403_v2 = vld [vmem:[%s2021_s19 + $0x8] sm:$0xff]  ;;  %v405_v3 = vld [vmem:[%s2021_s19 + $0x18] sm:$0xff]  ;;  %v402_v4 = vld [vmem:[%s2021_s19] sm:$0xff]  ;;  %v392_v31 = vlaneseq }
  0xbc   : > { %v1276_v5 = vpack.c.bf16 %v405_v3, %v403_v2  ;;  %v404_v6 = vld [vmem:[%s2021_s19 + $0x10] sm:$0xff]  ;;  %v407_v7 = vld [vmem:[%s2021_s19 + $0x28] sm:$0xff]  ;;  %v409_v8 = vld [vmem:[%s2021_s19 + $0x38] sm:$0xff] }
  0xbd   : > { %v1278_v9 = vpack.c.bf16 %v404_v6, %v402_v4  ;;  %v1280_v10 = vpack.c.bf16 %v409_v8, %v407_v7  ;;  %v406_v11 = vld [vmem:[%s2021_s19 + $0x20] sm:$0xff]  ;;  %v408_v12 = vld [vmem:[%s2021_s19 + $0x30] sm:$0xff]  ;;  %v411_v13 = vld [vmem:[%s2021_s19 + $0x48] sm:$0xff]  ;;  %v2078_v38 = vshrl.u32 %v392_v31, 7 }
  0xbe   : > { %1277 = vmatprep.subr.bf16.mxu0 %v1276_v5  ;;  %v413_v14 = vld [vmem:[%s2021_s19 + $0x58] sm:$0xff]  ;;  %v1282_v15 = vpack.c.bf16 %v408_v12, %v406_v11  ;;  %v410_v17 = vld [vmem:[%s2021_s19 + $0x40] sm:$0xff]  ;;  %v412_v18 = vld [vmem:[%s2021_s19 + $0x50] sm:$0xff] }
  0xbf   : > { %1279 = vmatpush1.bf16.msra.mxu0 %v1278_v9  ;;  %v1284_v16 = vpack.c.bf16 %v413_v14, %v411_v13  ;;  %v415_v19 = vld [vmem:[%s2021_s19 + $0x68] sm:$0xff]  ;;  %v417_v20 = vld [vmem:[%s2021_s19 + $0x78] sm:$0xff]  ;;  %v1286_v21 = vpack.c.bf16 %v412_v18, %v410_v17  ;;  %v414_v23 = vld [vmem:[%s2021_s19 + $0x60] sm:$0xff]  ;;  %vm394_vm0 = vcmp.lt.s32.totalorder %v2078_v38, 7  ;;  %vm399_vm1 = vcmp.lt.s32.totalorder %v2078_v38, 6 }
  0xc0   : > { %1281 = vmatprep.subr.bf16.mxu0 %v1280_v10  ;;  %v1288_v22 = vpack.c.bf16 %v417_v20, %v415_v19  ;;  %v416_v24 = vld [vmem:[%s2021_s19 + $0x70] sm:$0xff]  ;;  %v419_v25 = vld [vmem:[%s2021_s19 + $0x88] sm:$0xff]  ;;  %v421_v26 = vld [vmem:[%s2021_s19 + $0x98] sm:$0xff]  ;;  %vm679_vm3 = vcmp.lt.s32.totalorder %v2078_v38, 2  ;;  %vm688_vm4 = vcmp.lt.s32.totalorder %v2078_v38, 1 }
  0xc1   : > { %v1290_v27 = vpack.c.bf16 %v416_v24, %v414_v23  ;;  %v1292_v28 = vpack.c.bf16 %v421_v26, %v419_v25  ;;  %v418_v29 = vld [vmem:[%s2021_s19 + $0x80] sm:$0xff]  ;;  %v420_v30 = vld [vmem:[%s2021_s19 + $0x90] sm:$0xff]  ;;  %v423_v32 = vld [vmem:[%s2021_s19 + $0xa8] sm:$0xff] }
  0xc2   : > { %v425_v33 = vld [vmem:[%s2021_s19 + $0xb8] sm:$0xff]  ;;  %v1294_v34 = vpack.c.bf16 %v420_v30, %v418_v29  ;;  %v422_v36 = vld [vmem:[%s2021_s19 + $0xa0] sm:$0xff]  ;;  %v424_v37 = vld [vmem:[%s2021_s19 + $0xb0] sm:$0xff] }
  0xc3   : > { %1283 = vmatpush1.bf16.msra.mxu0 %v1282_v15  ;;  %v1296_v35 = vpack.c.bf16 %v425_v33, %v423_v32  ;;  %v427_v39 = vld [vmem:[%s2021_s19 + $0xc8] sm:$0xff]  ;;  %v429_v40 = vld [vmem:[%s2021_s19 + $0xd8] sm:$0xff]  ;;  %v1298_v41 = vpack.c.bf16 %v424_v37, %v422_v36  ;;  %v426_v42 = vld [vmem:[%s2021_s19 + $0xc0] sm:$0xff] }
  0xc4   : > { %1285 = vmatprep.subr.bf16.mxu0 %v1284_v16  ;;  %v1300_v43 = vpack.c.bf16 %v429_v40, %v427_v39  ;;  %v428_v44 = vld [vmem:[%s2021_s19 + $0xd0] sm:$0xff]  ;;  %v2086_v46 = vld [vmem:[#allocation2 + $0x8] sm:$0xff]  ;;  %v431_v47 = vld [vmem:[%s2021_s19 + $0xe8] sm:$0xff] }
  0xc5   : > { %v2084_v45 = vld [vmem:[#allocation2] sm:$0xff]  ;;  %v433_v48 = vld [vmem:[%s2021_s19 + $0xf8] sm:$0xff]  ;;  %v391_v50 = vrot.slane %v2086_v46, 1  ;;  %v1302_v51 = vpack.c.bf16 %v428_v44, %v426_v42  ;;  %v430_v54 = vld [vmem:[%s2021_s19 + $0xe0] sm:$0xff] }
  0xc6   : > { %v390_v49 = vrot.slane %v2084_v45, 1  ;;  %v1304_v53 = vpack.c.bf16 %v433_v48, %v431_v47  ;;  %v432_v55 = vld [vmem:[%s2021_s19 + $0xf0] sm:$0xff]  ;;  %v435_v56 = vld [vmem:[%s2021_s19 + $0x108] sm:$0xff]  ;;  %v437_v57 = vld [vmem:[%s2021_s19 + $0x118] sm:$0xff] }
  0xc7   : > { %1287 = vmatpush1.bf16.msra.mxu0 %v1286_v21  ;;  %v1306_v58 = vpack.c.bf16 %v432_v55, %v430_v54  ;;  %v1308_v59 = vpack.c.bf16 %v437_v57, %v435_v56  ;;  %v434_v60 = vld [vmem:[%s2021_s19 + $0x100] sm:$0xff]  ;;  %v436_v61 = vld [vmem:[%s2021_s19 + $0x110] sm:$0xff]  ;;  %v439_v62 = vld [vmem:[%s2021_s19 + $0x128] sm:$0xff] }
  0xc8   : > { %1289 = vmatprep.subr.bf16.mxu0 %v1288_v22  ;;  %v395_v52 = vsel %vm394_vm0, %v390_v49, %v391_v50  ;;  %v441_v63 = vld [vmem:[%s2021_s19 + $0x138] sm:$0xff]  ;;  %v438_v0 = vld [vmem:[%s2021_s19 + $0x120] sm:$0xff]  ;;  %v440_v1 = vld [vmem:[%s2021_s19 + $0x130] sm:$0xff]  ;;  %v1310_v2 = vpack.c.bf16 %v436_v61, %v434_v60 }
  0xc9   : > { %574 = vmatprep.mubr.f32.mxu0 %v395_v52  ;;  %v443_v3 = vld [vmem:[%s2021_s19 + $0x148] sm:$0xff]  ;;  %v445_v4 = vld [vmem:[%s2021_s19 + $0x158] sm:$0xff]  ;;  %v1312_v6 = vpack.c.bf16 %v441_v63, %v439_v62  ;;  %v1314_v19 = vpack.c.bf16 %v440_v1, %v438_v0  ;;  %v442_v21 = vld [vmem:[%s2021_s19 + $0x140] sm:$0xff] }
  0xca   : > { %v709_v5 = vld [vmem:[%s2035_s18 + $0x80] sm:$0xff]  ;;  %v710_v7 = vld [vmem:[%s2035_s18 + $0x88] sm:$0xff]  ;;  %v711_v12 = vld [vmem:[%s2035_s18 + $0x90] sm:$0xff]  ;;  %v1316_v20 = vpack.c.bf16 %v445_v4, %v443_v3 }
  0xcb   : > { %1291 = vmatpush1.bf16.msra.mxu0 %v1290_v27  ;;  %v693_v8 = vld [vmem:[%s2035_s18] sm:$0xff]  ;;  %v694_v9 = vld [vmem:[%s2035_s18 + $0x8] sm:$0xff]  ;;  %v1372_v10 = vpack.c.bf16 %v710_v7, %v709_v5  ;;  %v712_v13 = vld [vmem:[%s2035_s18 + $0x98] sm:$0xff] }
  0xcc   : > { %1293 = vmatprep.subr.bf16.mxu0 %v1292_v28  ;;  %v1374_v11 = vpack.c.bf16 %v694_v9, %v693_v8  ;;  %v695_v14 = vld [vmem:[%s2035_s18 + $0x10] sm:$0xff]  ;;  %v1376_v15 = vpack.c.bf16 %v712_v13, %v711_v12  ;;  %v696_v16 = vld [vmem:[%s2035_s18 + $0x18] sm:$0xff]  ;;  %v713_v17 = vld [vmem:[%s2035_s18 + $0xa0] sm:$0xff] }
  0xcd   : > { %v714_v18 = vld [vmem:[%s2035_s18 + $0xa8] sm:$0xff]  ;;  %1373 = vmatprep.subr.bf16.mxu1 %v1372_v10  ;;  %v1378_v24 = vpack.c.bf16 %v696_v16, %v695_v14  ;;  %v449_v25 = vld [vmem:[%s2021_s19 + $0x178] sm:$0xff]  ;;  %v697_v27 = vld [vmem:[%s2035_s18 + $0x20] sm:$0xff] }
  0xce   : > { %v444_v22 = vld [vmem:[%s2021_s19 + $0x150] sm:$0xff]  ;;  %v447_v23 = vld [vmem:[%s2021_s19 + $0x168] sm:$0xff]  ;;  %1375 = vmatpush3.bf16.msra.mxu1 %v1374_v11  ;;  %v1380_v26 = vpack.c.bf16 %v714_v18, %v713_v17  ;;  %v716_v30 = vld [vmem:[%s2035_s18 + $0xb8] sm:$0xff] }
  0xcf   : > { %1295 = vmatpush1.bf16.msra.mxu0 %v1294_v34  ;;  %1377 = vmatprep.subr.bf16.mxu1 %v1376_v15  ;;  %v698_v28 = vld [vmem:[%s2035_s18 + $0x28] sm:$0xff]  ;;  %v715_v29 = vld [vmem:[%s2035_s18 + $0xb0] sm:$0xff]  ;;  %v1318_v31 = vpack.c.bf16 %v444_v22, %v442_v21  ;;  %v1320_v32 = vpack.c.bf16 %v449_v25, %v447_v23  ;;  %v446_v33 = vld [vmem:[%s2021_s19 + $0x160] sm:$0xff]  ;;  %v396_v23 = vsel %vm394_vm0, %v391_v50, %v390_v49  ;;  %v1756_v50 = vmov 0.0  }
  0xd0   : > { %1297 = vmatprep.subr.bf16.mxu0 %v1296_v35  ;;  %v448_v34 = vld [vmem:[%s2021_s19 + $0x170] sm:$0xff]  ;;  %v451_v35 = vld [vmem:[%s2021_s19 + $0x188] sm:$0xff]  ;;  %v1382_v36 = vpack.c.bf16 %v698_v28, %v697_v27  ;;  %v453_v37 = vld [vmem:[%s2021_s19 + $0x198] sm:$0xff]  ;;  %v1384_v39 = vpack.c.bf16 %v716_v30, %v715_v29 }
  0xd1   : > { %v699_v40 = vld [vmem:[%s2035_s18 + $0x30] sm:$0xff]  ;;  %v717_v42 = vld [vmem:[%s2035_s18 + $0xc0] sm:$0xff]  ;;  %v1322_v44 = vpack.c.bf16 %v448_v34, %v446_v33  ;;  %v1324_v47 = vpack.c.bf16 %v453_v37, %v451_v35  ;;  %v702_v57 = vld [vmem:[%s2035_s18 + $0x48] sm:$0xff] }
  0xd2   : > { %1379 = vmatpush3.bf16.msra.mxu1 %v1378_v24  ;;  %v450_v48 = vld [vmem:[%s2021_s19 + $0x180] sm:$0xff]  ;;  %v455_v52 = vld [vmem:[%s2021_s19 + $0x1a8] sm:$0xff]  ;;  %v457_v54 = vld [vmem:[%s2021_s19 + $0x1b8] sm:$0xff] }
  0xd3   : > { %1299 = vmatpush1.bf16.msra.mxu0 %v1298_v41  ;;  %1381 = vmatprep.subr.bf16.mxu1 %v1380_v26  ;;  %v700_v41 = vld [vmem:[%s2035_s18 + $0x38] sm:$0xff]  ;;  %v701_v56 = vld [vmem:[%s2035_s18 + $0x40] sm:$0xff]  ;;  %v456_v61 = vld [vmem:[%s2021_s19 + $0x1b0] sm:$0xff] }
  0xd4   : > { %1301 = vmatprep.subr.bf16.mxu0 %v1300_v43  ;;  %v718_v43 = vld [vmem:[%s2035_s18 + $0xc8] sm:$0xff]  ;;  %v454_v60 = vld [vmem:[%s2021_s19 + $0x1a0] sm:$0xff]  ;;  %v1390_v62 = vpack.c.bf16 %v702_v57, %v701_v56  ;;  %v461_v0 = vld [vmem:[%s2021_s19 + $0x1d8] sm:$0xff] }
  0xd5   : > { %v1388_v55 = vpack.c.bf16 %v718_v43, %v717_v42  ;;  %v459_v63 = vld [vmem:[%s2021_s19 + $0x1c8] sm:$0xff]  ;;  %v1330_v1 = vpack.c.bf16 %v456_v61, %v454_v60  ;;  %v458_v3 = vld [vmem:[%s2021_s19 + $0x1c0] sm:$0xff]  ;;  %v460_v4 = vld [vmem:[%s2021_s19 + $0x1d0] sm:$0xff] }
  0xd6   : > { %1383 = vmatpush3.bf16.msra.mxu1 %v1382_v36  ;;  %v463_v5 = vld [vmem:[%s2021_s19 + $0x1e8] sm:$0xff]  ;;  %v1334_v7 = vpack.c.bf16 %v460_v4, %v458_v3  ;;  %v462_v9 = vld [vmem:[%s2021_s19 + $0x1e0] sm:$0xff]  ;;  %v464_v10 = vld [vmem:[%s2021_s19 + $0x1f0] sm:$0xff] }
  0xd7   : > { %1303 = vmatpush1.bf16.msra.mxu0 %v1302_v51  ;;  %v452_v51 = vld [vmem:[%s2021_s19 + $0x190] sm:$0xff]  ;;  %1385 = vmatprep.subr.bf16.mxu1 %v1384_v39  ;;  %v467_v11 = vld [vmem:[%s2021_s19 + $0x208] sm:$0xff]  ;;  %v469_v12 = vld [vmem:[%s2021_s19 + $0x218] sm:$0xff]  ;;  %v1338_v13 = vpack.c.bf16 %v464_v10, %v462_v9 }
  0xd8   : > { %1305 = vmatprep.subr.bf16.mxu0 %v1304_v53  ;;  %v1386_v53 = vpack.c.bf16 %v700_v41, %v699_v40  ;;  %v1340_v14 = vpack.c.bf16 %v469_v12, %v467_v11  ;;  %v466_v15 = vld [vmem:[%s2021_s19 + $0x200] sm:$0xff]  ;;  %v468_v16 = vld [vmem:[%s2021_s19 + $0x210] sm:$0xff]  ;;  %v471_v17 = vld [vmem:[%s2021_s19 + $0x228] sm:$0xff] }
  0xd9   : > { %v473_v18 = vld [vmem:[%s2021_s19 + $0x238] sm:$0xff]  ;;  %v470_v21 = vld [vmem:[%s2021_s19 + $0x220] sm:$0xff]  ;;  %v472_v22 = vld [vmem:[%s2021_s19 + $0x230] sm:$0xff] }
  0xda   : > { %1387 = vmatpush3.bf16.msra.mxu1 %v1386_v53  ;;  %v475_v24 = vld [vmem:[%s2021_s19 + $0x248] sm:$0xff]  ;;  %v477_v25 = vld [vmem:[%s2021_s19 + $0x258] sm:$0xff]  ;;  %v1346_v26 = vpack.c.bf16 %v472_v22, %v470_v21  ;;  %v474_v28 = vld [vmem:[%s2021_s19 + $0x240] sm:$0xff] }
  0xdb   : > { %1307 = vmatpush1.bf16.msra.mxu0 %v1306_v58  ;;  %v1326_v58 = vpack.c.bf16 %v452_v51, %v450_v48  ;;  %1389 = vmatprep.subr.bf16.mxu1 %v1388_v55  ;;  %v1348_v27 = vpack.c.bf16 %v477_v25, %v475_v24  ;;  %v476_v29 = vld [vmem:[%s2021_s19 + $0x250] sm:$0xff]  ;;  %v479_v30 = vld [vmem:[%s2021_s19 + $0x268] sm:$0xff]  ;;  %v478_v33 = vld [vmem:[%s2021_s19 + $0x260] sm:$0xff] }
  0xdc   : > { %1309 = vmatprep.subr.bf16.mxu0 %v1308_v59  ;;  %v1328_v59 = vpack.c.bf16 %v457_v54, %v455_v52  ;;  %v1350_v49 = vpack.c.bf16 %v476_v29, %v474_v28  ;;  %v480_v34 = vld [vmem:[%s2021_s19 + $0x270] sm:$0xff]  ;;  %v483_v35 = vld [vmem:[%s2021_s19 + $0x288] sm:$0xff]  ;;  %v485_v36 = vld [vmem:[%s2021_s19 + $0x298] sm:$0xff]  ;;  %v502_v28 = vsub.s32 0, %v2078_v38 }
  0xdd   : > { %v1354_v37 = vpack.c.bf16 %v480_v34, %v478_v33  ;;  %v1356_v39 = vpack.c.bf16 %v485_v36, %v483_v35  ;;  %v482_v40 = vld [vmem:[%s2021_s19 + $0x280] sm:$0xff]  ;;  %v484_v41 = vld [vmem:[%s2021_s19 + $0x290] sm:$0xff]  ;;  %v487_v42 = vld [vmem:[%s2021_s19 + $0x2a8] sm:$0xff] }
  0xde   : > { %1391 = vmatpush3.bf16.msra.mxu1 %v1390_v62  ;;  %v489_v43 = vld [vmem:[%s2021_s19 + $0x2b8] sm:$0xff]  ;;  %v486_v48 = vld [vmem:[%s2021_s19 + $0x2a0] sm:$0xff]  ;;  %v488_v51 = vld [vmem:[%s2021_s19 + $0x2b0] sm:$0xff] }
  0xdf   : > { %1311 = vmatpush1.bf16.msra.mxu0 %v1310_v2  ;;  %v1332_v2 = vpack.c.bf16 %v461_v0, %v459_v63  ;;  %v491_v52 = vld [vmem:[%s2021_s19 + $0x2c8] sm:$0xff]  ;;  %v493_v53 = vld [vmem:[%s2021_s19 + $0x2d8] sm:$0xff]  ;;  %v1362_v54 = vpack.c.bf16 %v488_v51, %v486_v48  ;;  %v490_v56 = vld [vmem:[%s2021_s19 + $0x2c0] sm:$0xff] }
  0xe0   : > { %1313 = vmatprep.subr.bf16.mxu0 %v1312_v6  ;;  %v465_v6 = vld [vmem:[%s2021_s19 + $0x1f8] sm:$0xff]  ;;  %v1364_v55 = vpack.c.bf16 %v493_v53, %v491_v52  ;;  %v492_v57 = vld [vmem:[%s2021_s19 + $0x2d0] sm:$0xff]  ;;  %v494_v62 = vld [vmem:[%s2021_s19 + $0x2e0] sm:$0xff] }
  0xe1   : > { %v1336_v8 = vpack.c.bf16 %v465_v6, %v463_v5  ;;  %v1366_v60 = vpack.c.bf16 %v492_v57, %v490_v56  ;;  %v496_v63 = vld [vmem:[%s2021_s19 + $0x2f0] sm:$0xff]  ;;  %v720_v6 = vld [vmem:[%s2035_s18 + $0xd8] sm:$0xff]  ;;  %v721_v11 = vld [vmem:[%s2035_s18 + $0xe0] sm:$0xff] }
  0xe2   : > { %v1370_v0 = vpack.c.bf16 %v496_v63, %v494_v62  ;;  %v719_v5 = vld [vmem:[%s2035_s18 + $0xd0] sm:$0xff]  ;;  %v704_v9 = vld [vmem:[%s2035_s18 + $0x58] sm:$0xff]  ;;  %v722_v12 = vld [vmem:[%s2035_s18 + $0xe8] sm:$0xff] }
  0xe3   : > { %1315 = vmatpush1.bf16.msra.mxu0 %v1314_v19  ;;  %v1342_v19 = vpack.c.bf16 %v468_v16, %v466_v15  ;;  %v706_v15 = vld [vmem:[%s2035_s18 + $0x68] sm:$0xff]  ;;  %v708_v21 = vld [vmem:[%s2035_s18 + $0x78] sm:$0xff]  ;;  %v743_v52 = vld [vmem:[%s2035_s18 + $0x190] sm:$0xff] }
  0xe4   : > { %1317 = vmatprep.subr.bf16.mxu0 %v1316_v20  ;;  %v1344_v20 = vpack.c.bf16 %v473_v18, %v471_v17  ;;  %v723_v17 = vld [vmem:[%s2035_s18 + $0xf0] sm:$0xff]  ;;  %v724_v18 = vld [vmem:[%s2035_s18 + $0xf8] sm:$0xff]  ;;  %v742_v24 = vld [vmem:[%s2035_s18 + $0x188] sm:$0xff] }
  0xe5   : > { %v744_v53 = vld [vmem:[%s2035_s18 + $0x198] sm:$0xff]  ;;  %v745_v63 = vld [vmem:[%s2035_s18 + $0x1a0] sm:$0xff] }
  0xe7   : > { %1319 = vmatpush1.bf16.msra.mxu0 %v1318_v31  ;;  %v481_v31 = vld [vmem:[%s2021_s19 + $0x278] sm:$0xff] }
  0xe8   : > { %1321 = vmatprep.subr.bf16.mxu0 %v1320_v32  ;;  %v1352_v32 = vpack.c.bf16 %v481_v31, %v479_v30 }
  0xeb   : > { %1323 = vmatpush1.bf16.msra.mxu0 %v1322_v44  ;;  %v1358_v44 = vpack.c.bf16 %v484_v41, %v482_v40 }
  0xec   : > { %1325 = vmatprep.subr.bf16.mxu0 %v1324_v47  ;;  %v1360_v47 = vpack.c.bf16 %v489_v43, %v487_v42 }
  0xef   : > { %1327 = vmatpush1.bf16.msra.mxu0 %v1326_v58  ;;  %v495_v58 = vld [vmem:[%s2021_s19 + $0x2e8] sm:$0xff] }
  0xf0   : > { %1329 = vmatprep.subr.bf16.mxu0 %v1328_v59  ;;  %v497_v59 = vld [vmem:[%s2021_s19 + $0x2f8] sm:$0xff] }
  0xf1   : > { %v1368_v61 = vpack.c.bf16 %v497_v59, %v495_v58  ;;  %v1408_v59 = vpack.c.bf16 %v744_v53, %v743_v52  ;;  %v773_v52 = vld [vmem:[%s2035_s18 + $0x280] sm:$0xff]  ;;  %v774_v53 = vld [vmem:[%s2035_s18 + $0x288] sm:$0xff] }
  0xf3   : > { %1331 = vmatpush1.bf16.msra.mxu0 %v1330_v1  ;;  %v397_v1 = vrot.slane %v2084_v45, 2 }
  0xf4   : > { %1333 = vmatprep.subr.bf16.mxu0 %v1332_v2  ;;  %v398_v2 = vrot.slane %v2086_v46, 2 }
  0xf6   : > { %v400_v3 = vsel %vm399_vm1, %v397_v1, %v398_v2  ;;  %v401_v4 = vsel %vm399_vm1, %v398_v2, %v397_v1 }
  0xf7   : > { %1335 = vmatpush1.bf16.msra.mxu0 %v1334_v7  ;;  %v1392_v7 = vpack.c.bf16 %v720_v6, %v719_v5  ;;  %v729_v6 = vld [vmem:[%s2035_s18 + $0x120] sm:$0xff] }
  0xf8   : > { %1337 = vmatprep.subr.bf16.mxu0 %v1336_v8  ;;  %v703_v8 = vld [vmem:[%s2035_s18 + $0x50] sm:$0xff] }
  0xf9   : > { %v1394_v10 = vpack.c.bf16 %v704_v9, %v703_v8  ;;  %1393 = vmatprep.subr.bf16.mxu1 %v1392_v7  ;;  %v730_v7 = vld [vmem:[%s2035_s18 + $0x128] sm:$0xff]  ;;  %v747_v9 = vld [vmem:[%s2035_s18 + $0x1b0] sm:$0xff] }
  0xfb   : > { %1339 = vmatpush1.bf16.msra.mxu0 %v1338_v13  ;;  %1395 = vmatpush3.bf16.msra.mxu1 %v1394_v10  ;;  %v1396_v13 = vpack.c.bf16 %v722_v12, %v721_v11  ;;  %v748_v10 = vld [vmem:[%s2035_s18 + $0x1b8] sm:$0xff]  ;;  %v1414_v12 = vpack.c.bf16 %v730_v7, %v729_v6  ;;  %v778_v6 = vld [vmem:[%s2035_s18 + $0x2a8] sm:$0xff] }
  0xfc   : > { %1341 = vmatprep.subr.bf16.mxu0 %v1340_v14  ;;  %v705_v14 = vld [vmem:[%s2035_s18 + $0x60] sm:$0xff] }
  0xfd   : > { %v1398_v16 = vpack.c.bf16 %v706_v15, %v705_v14  ;;  %1397 = vmatprep.subr.bf16.mxu1 %v1396_v13  ;;  %v1416_v13 = vpack.c.bf16 %v748_v10, %v747_v9  ;;  %v731_v14 = vld [vmem:[%s2035_s18 + $0x130] sm:$0xff]  ;;  %v732_v15 = vld [vmem:[%s2035_s18 + $0x138] sm:$0xff]  ;;  %v761_v9 = vld [vmem:[%s2035_s18 + $0x220] sm:$0xff] }
  0xfe   : > { %575 = vmatmul.mubr.f32.vlgmr.msra.gmra.mrb[0].mxu0 %v2084_v45  ;;  %v762_v10 = vld [vmem:[%s2035_s18 + $0x228] sm:$0xff] }
  0xff   : > { %1343 = vmatpush1.bf16.msra.mxu0 %v1342_v19  ;;  %580 = vmatprep.mubr.f32.mxu0 %v396_v23  ;;  %v1400_v19 = vpack.c.bf16 %v724_v18, %v723_v17  ;;  %v741_v23 = vld [vmem:[%s2035_s18 + $0x180] sm:$0xff]  ;;  %v750_v17 = vld [vmem:[%s2035_s18 + $0x1c8] sm:$0xff]  ;;  %v1418_v18 = vpack.c.bf16 %v732_v15, %v731_v14  ;;  %v764_v14 = vld [vmem:[%s2035_s18 + $0x238] sm:$0xff] }
 0x100   : > { %1345 = vmatprep.subr.bf16.mxu0 %v1344_v20  ;;  %1399 = vmatpush3.bf16.msra.mxu1 %v1398_v16  ;;  %v707_v20 = vld [vmem:[%s2035_s18 + $0x70] sm:$0xff]  ;;  %v1404_v25 = vpack.c.bf16 %v742_v24, %v741_v23  ;;  %v749_v16 = vld [vmem:[%s2035_s18 + $0x1c0] sm:$0xff]  ;;  %v752_v23 = vld [vmem:[%s2035_s18 + $0x1d8] sm:$0xff] }
 0x101   : > { %v1402_v22 = vpack.c.bf16 %v708_v21, %v707_v20  ;;  %1401 = vmatprep.subr.bf16.mxu1 %v1400_v19  ;;  %v1420_v19 = vpack.c.bf16 %v750_v17, %v749_v16  ;;  %v733_v20 = vld [vmem:[%s2035_s18 + $0x140] sm:$0xff]  ;;  %v734_v21 = vld [vmem:[%s2035_s18 + $0x148] sm:$0xff] }
 0x102   : > { %581 = vmatmul.mubr.f32.gmra.mrb[2].mxu0 %v2086_v46  ;;  %v1422_v24 = vpack.c.bf16 %v734_v21, %v733_v20  ;;  %v781_v15 = vld [vmem:[%s2035_s18 + $0x2c0] sm:$0xff]  ;;  %v784_v20 = vld [vmem:[%s2035_s18 + $0x2d8] sm:$0xff] }
 0x103   : > { %1347 = vmatpush1.bf16.msra.mxu0 %v1346_v26  ;;  %651 = vmatprep.mubr.f32.mxu0 %v1756_v50  ;;  %v506_v26 = vsub.s32 1, %v2078_v38 }
 0x104   : > { %1349 = vmatprep.subr.bf16.mxu0 %v1348_v27  ;;  %1403 = vmatpush3.bf16.msra.mxu1 %v1402_v22  ;;  %v498_v27 = vld [vmem:[%s2029_s13] sm:$0x3]  ;;  %v751_v22 = vld [vmem:[%s2035_s18 + $0x1d0] sm:$0xff] }
 0x105   : > { %1405 = vmatprep.subr.bf16.mxu1 %v1404_v25  ;;  %v507_v29 = vrot.slane %v498_v27, %v506_v26  ;;  %v503_v30 = vrot.slane %v498_v27, %v502_v28  ;;  %v1424_v25 = vpack.c.bf16 %v752_v23, %v751_v22  ;;  %v735_v26 = vld [vmem:[%s2035_s18 + $0x150] sm:$0xff]  ;;  %v736_v27 = vld [vmem:[%s2035_s18 + $0x158] sm:$0xff]  ;;  %v753_v28 = vld [vmem:[%s2035_s18 + $0x1e0] sm:$0xff] }
 0x106   : > { %v767_v23 = vld [vmem:[%s2035_s18 + $0x250] sm:$0xff] }
 0x107   : > { %1351 = vmatpush1.bf16.msra.mxu0 %v1350_v49 }
 0x108   : > { %1353 = vmatprep.subr.bf16.mxu0 %v1352_v32 }
 0x10b   : > { %1355 = vmatpush1.bf16.msra.mxu0 %v1354_v37 }
 0x10c   : > { %1357 = vmatprep.subr.bf16.mxu0 %v1356_v39 }
 0x10f   : > { %1359 = vmatpush1.bf16.msra.mxu0 %v1358_v44  ;;  %v725_v44 = vld [vmem:[%s2035_s18 + $0x100] sm:$0xff] }
 0x110   : > { %1361 = vmatprep.subr.bf16.mxu0 %v1360_v47  ;;  %v726_v47 = vld [vmem:[%s2035_s18 + $0x108] sm:$0xff] }
 0x111   : > { %v1406_v57 = vpack.c.bf16 %v726_v47, %v725_v44  ;;  %v739_v47 = vld [vmem:[%s2035_s18 + $0x170] sm:$0xff] }
 0x113   : > { %1363 = vmatpush1.bf16.msra.mxu0 %v1362_v54 }
 0x114   : > { %1365 = vmatprep.subr.bf16.mxu0 %v1364_v55 }
 0x117   : > { %1367 = vmatpush1.bf16.msra.mxu0 %v1366_v60  ;;  %v727_v60 = vld [vmem:[%s2035_s18 + $0x110] sm:$0xff] }
 0x118   : > { %1369 = vmatprep.subr.bf16.mxu0 %v1368_v61  ;;  %v728_v61 = vld [vmem:[%s2035_s18 + $0x118] sm:$0xff] }
 0x11b   : > { %1371 = vmatpush1.bf16.msra.mxu0 %v1370_v0  ;;  %v746_v0 = vld [vmem:[%s2035_s18 + $0x1a8] sm:$0xff] }
 0x11c   : > { %v1412_v5 = vpack.c.bf16 %v746_v0, %v745_v63  ;;  %v759_v0 = vld [vmem:[%s2035_s18 + $0x210] sm:$0xff] }
 0x11e   : > { %652 = vmatmul.mubr.f32.vlgmr.msra.gmra.mrb[0].mxu0 %v400_v3  ;;  %v1410_v3 = vpack.c.bf16 %v728_v61, %v727_v60  ;;  %v776_v60 = vld [vmem:[%s2035_s18 + $0x298] sm:$0xff] }
 0x11f   : > { %657 = vmatprep.mubr.f32.mxu0 %v1756_v50  ;;  %v2214_v50 = vadd.s32 8, %v2078_v38  ;;  %v782_v38 = vld [vmem:[%s2035_s18 + $0x2c8] sm:$0xff] }
 0x120   : > { %v1452_v17 = vpack.c.bf16 %v782_v38, %v781_v15 }
 0x121   : > { %vm670_vm2 = vcmp.lt.s32.totalorder %v2214_v50, 14 }
 0x122   : > { %658 = vmatmul.mubr.f32.gmra.mrb[2].mxu0 %v401_v4 }
 0x1f1   : > { %v653_v31 = vpop.f32.mrb[0].mxu0 }
 0x1f2   : > { %v655_v49 = vpop.f32.mrb[1].mxu0  ;;  %v1468_v33 = vadd.f32 %v653_v31, %v503_v30 }
 0x1f3   : > { %v1469_v32 = vadd.f32 %v655_v49, %v507_v29  ;;  %v737_v49 = vld [vmem:[%s2035_s18 + $0x160] sm:$0xff] }
 0x1f4   : > { %v2224_v41 = vmax.f32 %v1468_v33, 0.0  ;;  %v755_v33 = vld [vmem:[%s2035_s18 + $0x1f0] sm:$0xff] }
 0x1f5   : > { %v659_v34 = vpop.f32.mrb[2].mxu0  ;;  %v2221_v39 = vmax.f32 %v1469_v32, 0.0  ;;  %v738_v32 = vld [vmem:[%s2035_s18 + $0x168] sm:$0xff] }
 0x1f6   : > { %v2216_v35 = vadd.f32 %v659_v34, %v503_v30  ;;  %v661_v36 = vpop.f32.mrb[3].mxu0  ;;  %v675_v56 = vrot.slane %v2224_v41, 6  ;;  %v1426_v30 = vpack.c.bf16 %v736_v27, %v735_v26  ;;  %v756_v34 = vld [vmem:[%s2035_s18 + $0x1f8] sm:$0xff]  ;;  %v684_v61 = vrot.slane %v2224_v41, 7  ;;  %v786_v26 = vld [vmem:[%s2035_s18 + $0x2e8] sm:$0xff] }
 0x1f7   : > { %v2219_v37 = vadd.f32 %v661_v36, %v507_v29  ;;  %v676_v55 = vrot.slane %v2221_v39, 6  ;;  %v685_v4 = vrot.slane %v2221_v39, 7  ;;  %v754_v29 = vld [vmem:[%s2035_s18 + $0x1e8] sm:$0xff]  ;;  %v1430_v36 = vpack.c.bf16 %v738_v32, %v737_v49  ;;  %v788_v49 = vld [vmem:[%s2035_s18 + $0x2f8] sm:$0xff] }
 0x1f8   : > { %v666_v40 = vmax.f32 %v2216_v35, 0.0  ;;  %v1428_v31 = vpack.c.bf16 %v754_v29, %v753_v28  ;;  %v1432_v44 = vpack.c.bf16 %v756_v34, %v755_v33  ;;  %v769_v29 = vld [vmem:[%s2035_s18 + $0x260] sm:$0xff]  ;;  %v771_v34 = vld [vmem:[%s2035_s18 + $0x270] sm:$0xff] }
 0x1f9   : > { %v667_v42 = vmax.f32 %v2219_v37, 0.0 }
 0x1fa   : > { %v2231_v43 = vsel %vm670_vm2, %v666_v40, 0.0 }
 0x1fb   : > { %v677_v48 = vrot.slane %v2231_v43, 6  ;;  %v2240_v51 = vsel %vm670_vm2, %v667_v42, 0.0 }
 0x1fc   : > { %v678_v54 = vrot.slane %v2240_v51, 6  ;;  %v687_v1 = vrot.slane %v2240_v51, 7  ;;  %v779_v51 = vld [vmem:[%s2035_s18 + $0x2b0] sm:$0xff] }
 0x1fd   : > { %v682_v62 = vsel %vm679_vm3, %v677_v48, %v675_v56  ;;  %v680_v8 = vsel %vm679_vm3, %v675_v56, %v677_v48  ;;  %v740_v48 = vld [vmem:[%s2035_s18 + $0x178] sm:$0xff]  ;;  %v757_v56 = vld [vmem:[%s2035_s18 + $0x200] sm:$0xff] }
 0x1fe   : > { %v683_v58 = vsel %vm679_vm3, %v678_v54, %v676_v55  ;;  %v681_v2 = vsel %vm679_vm3, %v676_v55, %v678_v54  ;;  %v692_v11 = vsel %vm688_vm4, %v687_v1, %v685_v4  ;;  %v1434_v54 = vpack.c.bf16 %v740_v48, %v739_v47 }
 0x1ff   : > { %860 = vmatprep.mubr.f32.mxu1 %v683_v58  ;;  %v1436_v55 = vpack.c.bf16 %v774_v53, %v773_v52  ;;  %v686_v58 = vrot.slane %v2231_v43, 7  ;;  %v690_v43 = vsel %vm688_vm4, %v685_v4, %v687_v1  ;;  %v1446_v1 = vpack.c.bf16 %v762_v10, %v761_v9 }
 0x200   : > { %861 = vmatmul.mubr.f32.vlgmr.msra.gmra.mrb[0].mxu1 %v682_v62 }
 0x201   : > { %1407 = vmatpush3.bf16.msra.mxu1 %v1406_v57  ;;  %865 = vmatprep.mubr.f32.mxu1 %v681_v2  ;;  %v758_v57 = vld [vmem:[%s2035_s18 + $0x208] sm:$0xff]  ;;  %v760_v2 = vld [vmem:[%s2035_s18 + $0x218] sm:$0xff] }
 0x202   : > { %1409 = vmatprep.subr.bf16.mxu1 %v1408_v59  ;;  %v775_v59 = vld [vmem:[%s2035_s18 + $0x290] sm:$0xff]  ;;  %v1438_v62 = vpack.c.bf16 %v758_v57, %v757_v56  ;;  %v1442_v7 = vpack.c.bf16 %v760_v2, %v759_v0  ;;  %v1156_v56 = vld [vmem:[%s338_s30] ss:$0 sm:$0xff]  ;;  %v1021_v0 = vld [vmem:[#allocation10] sm:$0xff] }
 0x203   : > { %v1440_v63 = vpack.c.bf16 %v776_v60, %v775_v59 }
 0x204   : > { %866 = vmatmul.mubr.f32.gmra.mrb[2].mxu1 %v680_v8 }
 0x205   : > { %1411 = vmatpush3.bf16.msra.mxu1 %v1410_v3  ;;  %935 = vmatprep.mubr.f32.mxu1 %v692_v11  ;;  %v691_v3 = vsel %vm688_vm4, %v686_v58, %v684_v61  ;;  %v689_v11 = vsel %vm688_vm4, %v684_v61, %v686_v58 }
 0x206   : > { %1413 = vmatprep.subr.bf16.mxu1 %v1412_v5  ;;  %v777_v5 = vld [vmem:[%s2035_s18 + $0x2a0] sm:$0xff] }
 0x207   : > { %v1444_v8 = vpack.c.bf16 %v778_v6, %v777_v5 }
 0x209   : > { %1415 = vmatpush3.bf16.msra.mxu1 %v1414_v12  ;;  %v780_v12 = vld [vmem:[%s2035_s18 + $0x2b8] sm:$0xff] }
 0x20a   : > { %1417 = vmatprep.subr.bf16.mxu1 %v1416_v13  ;;  %v1448_v4 = vpack.c.bf16 %v780_v12, %v779_v51  ;;  %v763_v13 = vld [vmem:[%s2035_s18 + $0x230] sm:$0xff] }
 0x20b   : > { %v1450_v16 = vpack.c.bf16 %v764_v14, %v763_v13 }
 0x20d   : > { %1419 = vmatpush3.bf16.msra.mxu1 %v1418_v18  ;;  %v765_v18 = vld [vmem:[%s2035_s18 + $0x240] sm:$0xff] }
 0x20e   : > { %1421 = vmatprep.subr.bf16.mxu1 %v1420_v19  ;;  %v766_v19 = vld [vmem:[%s2035_s18 + $0x248] sm:$0xff] }
 0x20f   : > { %v1454_v21 = vpack.c.bf16 %v766_v19, %v765_v18 }
 0x211   : > { %1423 = vmatpush3.bf16.msra.mxu1 %v1422_v24  ;;  %v768_v24 = vld [vmem:[%s2035_s18 + $0x258] sm:$0xff] }
 0x212   : > { %1425 = vmatprep.subr.bf16.mxu1 %v1424_v25  ;;  %v785_v25 = vld [vmem:[%s2035_s18 + $0x2e0] sm:$0xff]  ;;  %v1458_v27 = vpack.c.bf16 %v768_v24, %v767_v23 }
 0x213   : > { %v1460_v28 = vpack.c.bf16 %v786_v26, %v785_v25 }
 0x215   : > { %1427 = vmatpush3.bf16.msra.mxu1 %v1426_v30  ;;  %v770_v30 = vld [vmem:[%s2035_s18 + $0x268] sm:$0xff] }
 0x216   : > { %1429 = vmatprep.subr.bf16.mxu1 %v1428_v31  ;;  %v787_v31 = vld [vmem:[%s2035_s18 + $0x2f0] sm:$0xff]  ;;  %v1462_v32 = vpack.c.bf16 %v770_v30, %v769_v29 }
 0x217   : > { %v1464_v33 = vpack.c.bf16 %v788_v49, %v787_v31 }
 0x219   : > { %1431 = vmatpush3.bf16.msra.mxu1 %v1430_v36  ;;  %v772_v36 = vld [vmem:[%s2035_s18 + $0x278] sm:$0xff] }
 0x21a   : > { %1433 = vmatprep.subr.bf16.mxu1 %v1432_v44  ;;  %v1466_v44 = vpack.c.bf16 %v772_v36, %v771_v34 }
 0x21d   : > { %1435 = vmatpush3.bf16.msra.mxu1 %v1434_v54 }
 0x21e   : > { %1437 = vmatprep.subr.bf16.mxu1 %v1436_v55 }
 0x220   : > { %936 = vmatmul.mubr.f32.vlgmr.msra.gmra.mrb[4].mxu1 %v691_v3 }
 0x221   : > { %940 = vmatprep.mubr.f32.mxu1 %v690_v43  ;;  %1439 = vmatpush3.bf16.msra.mxu1 %v1438_v62 }
 0x222   : > { %1441 = vmatprep.subr.bf16.mxu1 %v1440_v63 }
 0x224   : > { %941 = vmatmul.mubr.f32.gmra.mrb[6].mxu1 %v689_v11 }
 0x225   : > { %1443 = vmatpush3.bf16.msra.mxu1 %v1442_v7  ;;  %1010 = vmatprep.mubr.f32.mxu1 %v2221_v39  ;;  %v783_v39 = vld [vmem:[%s2035_s18 + $0x2d0] sm:$0xff] }
 0x226   : > { %1445 = vmatprep.subr.bf16.mxu1 %v1444_v8  ;;  %v1456_v22 = vpack.c.bf16 %v784_v20, %v783_v39  ;;  %v1022_v7 = vld [vmem:[#allocation10 + $0x8] sm:$0xff] }
 0x229   : > { %1447 = vmatpush3.bf16.msra.mxu1 %v1446_v1 }
 0x22a   : > { %1449 = vmatprep.subr.bf16.mxu1 %v1448_v4 }
 0x22d   : > { %1451 = vmatpush3.bf16.msra.mxu1 %v1450_v16 }
 0x22e   : > { %1453 = vmatprep.subr.bf16.mxu1 %v1452_v17 }
 0x231   : > { %1455 = vmatpush3.bf16.msra.mxu1 %v1454_v21 }
 0x232   : > { %1457 = vmatprep.subr.bf16.mxu1 %v1456_v22 }
 0x235   : > { %1459 = vmatpush3.bf16.msra.mxu1 %v1458_v27 }
 0x236   : > { %1461 = vmatprep.subr.bf16.mxu1 %v1460_v28 }
 0x239   : > { %1463 = vmatpush3.bf16.msra.mxu1 %v1462_v32 }
 0x23a   : > { %1465 = vmatprep.subr.bf16.mxu1 %v1464_v33 }
 0x23d   : > { %1467 = vmatpush3.bf16.msra.mxu1 %v1466_v44 }
 0x240   : > { %1011 = vmatmul.mubr.f32.vlgmr.msra.gmra.mrb[8].mxu1 %v2224_v41 }
 0x241   : > { %1157 = vmatprep.mubr.msk.f32.mxu1 %vm670_vm2, %v667_v42 }
 0x244   : > { %1158 = vmatmul.mubr.msk.f32.gmra.mrb[10].mxu1 %vm670_vm2, %v666_v40 }
 0x2d3   : > { %v1194_v47 = vpop.f32.mrb[0].mxu1 }
 0x2d4   : > { %v1195_v48 = vpop.f32.mrb[1].mxu1 }
 0x2d5   : > { %v1196_v52 = vadd.f32 %v1195_v48, %v1194_v47 }
 0x2d7   : > { %v1197_v53 = vpop.f32.mrb[2].mxu1  ;;  %v863_v58 = vadd.f32 %v1196_v52, %v1156_v56 }
 0x2d8   : > { %v1198_v54 = vpop.f32.mrb[3].mxu1 }
 0x2d9   : > { %v1199_v55 = vadd.f32 %v1198_v54, %v1197_v53 }
 0x2db   : > { %v868_v61 = vadd.f32 %v1199_v55, %v1156_v56 }
 0x2f3   : > { %v1232_v57 = vpop.f32.mrb[4].mxu1 }
 0x2f4   : > { %v1233_v41 = vpop.f32.mrb[5].mxu1 }
 0x2f5   : > { %v1234_v37 = vadd.f32 %v1233_v41, %v1232_v57 }
 0x2f7   : > { %v938_v59 = vadd.f32 %v1234_v37, %v863_v58  ;;  %v1235_v60 = vpop.f32.mrb[6].mxu1 }
 0x2f8   : > { %v1236_v42 = vpop.f32.mrb[7].mxu1 }
 0x2f9   : > { %v1237_v35 = vadd.f32 %v1236_v42, %v1235_v60 }
 0x2fb   : > { %v943_v62 = vadd.f32 %v1237_v35, %v868_v61 }
 0x313   : > { %v1270_v50 = vpop.f32.mrb[8].mxu1 }
 0x314   : > { %v1271_v40 = vpop.f32.mrb[9].mxu1 }
 0x315   : > { %v1272_v63 = vadd.f32 %v1271_v40, %v1270_v50 }
 0x317   : > { %v1013_v2 = vadd.f32 %v1272_v63, %v938_v59  ;;  %v1273_v3 = vpop.f32.mrb[10].mxu1 }
 0x318   : > { %v1274_v5 = vpop.f32.mrb[11].mxu1 }
 0x319   : > { %v1023_v6 = vmul.f32 %v1021_v0, %v1013_v2  ;;  %v1275_v43 = vadd.f32 %v1274_v5, %v1273_v3 }
 0x31b   : > { %v1025_v8 = vadd.f32 %v1023_v6, %v2084_v45  ;;  %v1018_v9 = vadd.f32 %v1275_v43, %v943_v62 }
 0x31d   : > { %1027 = vst [vmem:[#allocation2] sm:$0xff] %v1025_v8  ;;  %1029 = vst [vmem:[%s2374_s6] sm:$0xff] %v1025_v8  ;;  %v1024_v10 = vmul.f32 %v1022_v7, %v1018_v9 }
 0x31f   : > { %v1026_v11 = vadd.f32 %v1024_v10, %v2086_v46 }
 0x321   : > { %1028 = vst [vmem:[#allocation2 + $0x8] sm:$0xff] %v1026_v11  ;;  %1030 = vst [vmem:[%s2374_s6 + $0x8] sm:$0xff] %v1026_v11 }
 0x322 PF: > { %s2405_s29 = sld [smem:[#allocation15_spill]]  ;;  %p22_p4 = scmp.ge.s32.totalorder %s1837_s7, 5  }
 0x323   : > { %s2406_s21 = smov %s1737_s22  ;;  %s2407_s22 = smov %s1741_s23 }
 0x324   : > { %s2409_s24 = smov %s1837_s7  ;;  %24 = sbr.rel (!%p22_p4) target bundleno = 11 (0xb), region = 125 }
 0x328   : > { %s2408_s23 = smov %s2405_s29 }
 0x32b   :  { %1042 = vsyncpa [#allocation4], 1 }
 0x32c   :  { %1044 = vsyncpa [#allocation4 + $0x1], 1 }
 0x32d   :  { %1045 = vsyncpa [#allocation6], 1 }
 0x32e   :  { %1047 = vsyncpa [#allocation6 + $0x1], 1 }
 0x32f   :  { %1048 = vsyncpa [#allocation9], 1 }
 0x330   :  { %1050 = vsyncpa [#allocation9 + $0x1], 1 }

</bundles_post_ra>
